<compile_context>
chip_gen: v5e
topology: v5e:2x2
jax: 0.10.0
libtpu: 0.0.40
codegen_flags: <defaults>
</compile_context>

<pallas_src>
import functools

import numpy as np
import jax
import jax.numpy as jnp
from jax.experimental import pallas as pl
from jax.experimental.pallas import tpu as pltpu


def _round_up(n, m):
    return (n + m - 1) // m * m


def _tree_kernel(depth, xt_ref, g_ref, p_ref, e_ref, b_ref, leaf_ref, out_ref):
    # Per-node feature gather on the MXU: (N, F) @ (F, TILE_B) -> (N, TILE_B).
    feats = jnp.dot(g_ref[...], xt_ref[...], preferred_element_type=jnp.float32)
    z = p_ref[...] - feats                       # (N,1) - (N,TILE_B)
    # sigmoid via a single EUP tanh (no exp + full-precision divide).
    d = 0.5 * jnp.tanh(0.5 * z) + 0.5            # per-node decisions (N, TILE_B)

    def level_term(lev):
        # expand[lev] is (L, N) with a single +/-1 in the ancestor column of each
        # leaf, so the matmul + bias computes term = s + (1-2s)*d_ancestor, i.e.
        # d (go left) or 1-d (go right), entirely on the MXU.
        return b_ref[lev] + jnp.dot(e_ref[lev], d,
                                    preferred_element_type=jnp.float32)

    path = level_term(0)                         # (L, TILE_B)
    for lev in range(1, depth):                  # static unroll; depth is a Python int
        path = path * level_term(lev)

    # (C, L) @ (L, TILE_B) -> (C, TILE_B): lane-dense output store.
    out_ref[...] = jnp.dot(leaf_ref[...], path, preferred_element_type=jnp.float32)


def _choose_tile(batch, depth, num_features, num_classes, max_tile_b):
    """Largest 128-multiple lane tile whose working set stays well under a
    conservative (v7x-safe) scoped-VMEM budget; v5e/v6e simply get the same
    (comfortably fitting) tile."""
    max_tile_b = max(128, max_tile_b)
    L = 2 ** depth
    N = L - 1
    const_bytes = 4 * (N * num_features + depth * L * N + depth * L
                       + num_classes * L + N)
    budget = 24 * 1024 * 1024                    # headroom under 32 MiB default scoped VMEM
    tile = 128
    for cand in (1024, 512, 256, 128):
        if cand > max_tile_b:
            continue
        stream = 2 * 4 * (num_features + num_classes) * cand     # double-buffered IO blocks
        live = 4 * (3 * L + N) * cand                             # path / term / d values
        if const_bytes + stream + live <= budget:
            tile = cand
            break
    tile = min(tile, _round_up(batch, 128))
    b_pad = _round_up(batch, tile)
    return tile, b_pad


def decision_tree_forward(x, ranked_features_indice, decision_params,
                          leaf_values, depth, *, max_tile_b=512):
    batch, num_features = x.shape
    L = 2 ** depth
    N = L - 1
    num_classes = leaf_values.shape[1]

    # ---------- compile-time tree structure (numpy, tiny) ----------
    lev = np.arange(depth)
    leaves = np.arange(L)
    sign = (leaves[None, :] >> (depth - 1 - lev)[:, None]) & 1     # 1 = go right
    within = leaves[None, :] >> (depth - lev)[:, None]             # ancestor idx within level
    node_abs = (2 ** lev - 1)[:, None] + within                    # absolute node index
    expand = np.zeros((depth, L, N), np.float32)
    expand[lev[:, None], leaves[None, :], node_abs] = 1.0 - 2.0 * sign
    bias = sign.astype(np.float32)[:, :, None]                     # (depth, L, 1)
    gather = np.zeros((N, num_features), np.float32)
    gather[np.arange(N), np.arange(N) % num_features] = 1.0        # node n -> feature n % F

    # ---------- glue: feature permutation, transpose to batch-on-lanes, pad ----------
    xp = x[:, ranked_features_indice].astype(jnp.float32)          # (B, F)
    tile_b, b_pad = _choose_tile(batch, depth, num_features, num_classes, max_tile_b)
    xt = jnp.pad(xp.T, ((0, 0), (0, b_pad - batch)))               # (F, B_pad)
    params2 = decision_params.astype(jnp.float32).reshape(N, 1)
    leaf_t = leaf_values.astype(jnp.float32).T                     # (C, L)
    expand_j = jnp.asarray(expand)
    bias_j = jnp.asarray(bias)
    gather_j = jnp.asarray(gather)

    grid = (b_pad // tile_b,)
    flops = (2 * b_pad * (N * num_features + depth * L * N + num_classes * L)
             + b_pad * (4 * N + 2 * depth * L))
    cost = pl.CostEstimate(
        flops=int(flops),
        transcendentals=int(b_pad * N),
        bytes_accessed=int(4 * ((num_features + num_classes) * b_pad
                                + N * num_features + depth * L * N
                                + depth * L + num_classes * L + N)))

    out_t = pl.pallas_call(
        functools.partial(_tree_kernel, depth),
        out_shape=jax.ShapeDtypeStruct((num_classes, b_pad), jnp.float32),
        grid=grid,
        in_specs=[
            pl.BlockSpec((num_features, tile_b), lambda i: (0, i)),   # streamed per tile
            pl.BlockSpec((N, num_features), lambda i: (0, 0)),        # resident constants
            pl.BlockSpec((N, 1), lambda i: (0, 0)),
            pl.BlockSpec((depth, L, N), lambda i: (0, 0, 0)),
            pl.BlockSpec((depth, L, 1), lambda i: (0, 0, 0)),
            pl.BlockSpec((num_classes, L), lambda i: (0, 0)),
        ],
        out_specs=pl.BlockSpec((num_classes, tile_b), lambda i: (0, i)),
        compiler_params=pltpu.CompilerParams(
            dimension_semantics=("parallel",)),   # batch tiles shard across TCs on v7x
        cost_estimate=cost,
    )(xt, gather_j, params2, expand_j, bias_j, leaf_t)

    return out_t[:, :batch].T                                       # (B, C)


def reference_forward(x, rfi, decision_params, leaf_values, depth):
    """Pure-JAX transcription of the PyTorch forward (for validation)."""
    batch, num_features = x.shape
    xp = x[:, rfi]
    path = jnp.ones((batch, 2 ** depth), dtype=jnp.float32)
    for level in range(depth):
        level_start = 2 ** level - 1
        idxs = jnp.arange(2 ** level)
        node_indices = level_start + idxs
        decisions = jax.nn.sigmoid(decision_params[node_indices][None, :]
                                   - xp[:, node_indices % num_features])
        parent = path[:, idxs]
        left = idxs * 2
        right = left + 1
        path = path.at[:, left].set(parent * decisions)
        path = path.at[:, right].set(parent * (1.0 - decisions))
    return path @ leaf_values


if __name__ == "__main__":
    depth = 3
    num_classes = 4
    batch = 8
    num_features = 16
    num_nodes = 2 ** depth - 1
    num_leaves = 2 ** depth

    key = jax.random.PRNGKey(0)
    k1, k2, k3, k4, k5 = jax.random.split(key, 5)
    x = jax.random.normal(k1, (batch, num_features), dtype=jnp.float32)
    decision_params = jax.random.normal(k2, (num_nodes,), dtype=jnp.float32)
    leaf_values = jax.random.normal(k3, (num_leaves, num_classes), dtype=jnp.float32)
    ranked_features_indice = jax.random.permutation(k4, num_features)

    out = decision_tree_forward(x, ranked_features_indice, decision_params,
                                leaf_values, depth)
    jax.block_until_ready(out)
    ref = reference_forward(x, ranked_features_indice, decision_params,
                            leaf_values, depth)
    assert out.shape == (batch, num_classes)
    assert jnp.allclose(out, ref, rtol=1e-4, atol=1e-4), (out, ref)

    # Also exercise the batch-tiled (multi-step grid) pipeline path.
    xb = jax.random.normal(k5, (300, num_features), dtype=jnp.float32)
    out_b = decision_tree_forward(xb, ranked_features_indice, decision_params,
                                  leaf_values, depth, max_tile_b=128)
    jax.block_until_ready(out_b)
    ref_b = reference_forward(xb, ranked_features_indice, decision_params,
                              leaf_values, depth)
    assert out_b.shape == (300, num_classes)
    assert jnp.allclose(out_b, ref_b, rtol=1e-4, atol=1e-4)

    print("KERNEL_OK")
</pallas_src>

<mosaic_0001>
module attributes {stable_mosaic.version = 11 : i64} {
  func.func @_tree_kernel(%arg0: i32, %arg1: memref<16x128xf32, #tpu.memory_space<vmem>>, %arg2: memref<7x16xf32, #tpu.memory_space<vmem>>, %arg3: memref<7x1xf32, #tpu.memory_space<vmem>>, %arg4: memref<3x8x7xf32, #tpu.memory_space<vmem>>, %arg5: memref<3x8x1xf32, #tpu.memory_space<vmem>>, %arg6: memref<4x8xf32, #tpu.memory_space<vmem>>, %arg7: memref<4x128xf32, #tpu.memory_space<vmem>>) attributes {dimension_semantics = [#tpu.dimension_semantics<parallel>], iteration_bounds = array<i64: 1>, scalar_prefetch = 0 : i64, scratch_operands = 0 : i64, tpu.core_type = #tpu.core_type<tc>, window_params = [{transform_indices = @transform_0, window_bounds = array<i64: 16, 128>}, {pipeline_mode = #tpu.pipeline_mode<synchronous>, transform_indices = @transform_1, window_bounds = array<i64: 7, 16>}, {pipeline_mode = #tpu.pipeline_mode<synchronous>, transform_indices = @transform_2, window_bounds = array<i64: 7, 1>}, {pipeline_mode = #tpu.pipeline_mode<synchronous>, transform_indices = @transform_3, window_bounds = array<i64: 3, 8, 7>}, {pipeline_mode = #tpu.pipeline_mode<synchronous>, transform_indices = @transform_4, window_bounds = array<i64: 3, 8, 1>}, {pipeline_mode = #tpu.pipeline_mode<synchronous>, transform_indices = @transform_5, window_bounds = array<i64: 4, 8>}, {transform_indices = @transform_6, window_bounds = array<i64: 4, 128>}]} {
    %c0 = arith.constant 0 : index
    %c0_0 = arith.constant 0 : index
    %0 = vector.load %arg2[%c0, %c0_0] : memref<7x16xf32, #tpu.memory_space<vmem>>, vector<7x16xf32>
    %c0_1 = arith.constant 0 : index
    %c0_2 = arith.constant 0 : index
    %1 = vector.load %arg1[%c0_1, %c0_2] : memref<16x128xf32, #tpu.memory_space<vmem>>, vector<16x128xf32>
    %cst = arith.constant dense<0.000000e+00> : vector<7x128xf32>
    %2 = tpu.matmul %0, %1, %cst {dimension_numbers = #tpu.dot_dimension_numbers<[1], [0], [0], [1], [0, 0, 1, 1], [], []>} : vector<7x16xf32>, vector<16x128xf32>, vector<7x128xf32> -> vector<7x128xf32>
    %c0_3 = arith.constant 0 : index
    %c0_4 = arith.constant 0 : index
    %3 = vector.load %arg3[%c0_3, %c0_4] : memref<7x1xf32, #tpu.memory_space<vmem>>, vector<7x1xf32>
    %4 = vector.broadcast %3 : vector<7x1xf32> to vector<7x128xf32>
    %5 = arith.subf %4, %2 : vector<7x128xf32>
    %cst_5 = arith.constant 5.000000e-01 : f32
    %6 = vector.broadcast %cst_5 : f32 to vector<7x128xf32>
    %7 = arith.mulf %6, %5 : vector<7x128xf32>
    %8 = math.tanh %7 : vector<7x128xf32>
    %cst_6 = arith.constant 5.000000e-01 : f32
    %9 = vector.broadcast %cst_6 : f32 to vector<7x128xf32>
    %10 = arith.mulf %9, %8 : vector<7x128xf32>
    %cst_7 = arith.constant 5.000000e-01 : f32
    %11 = vector.broadcast %cst_7 : f32 to vector<7x128xf32>
    %12 = arith.addf %10, %11 : vector<7x128xf32>
    %c0_8 = arith.constant 0 : index
    %c0_9 = arith.constant 0 : index
    %c0_10 = arith.constant 0 : index
    %13 = vector.load %arg5[%c0_8, %c0_9, %c0_10] : memref<3x8x1xf32, #tpu.memory_space<vmem>>, vector<1x8x1xf32>
    %14 = vector.shape_cast %13 : vector<1x8x1xf32> to vector<8x1xf32>
    %c0_11 = arith.constant 0 : index
    %c0_12 = arith.constant 0 : index
    %c0_13 = arith.constant 0 : index
    %15 = vector.load %arg4[%c0_11, %c0_12, %c0_13] : memref<3x8x7xf32, #tpu.memory_space<vmem>>, vector<1x8x7xf32>
    %16 = vector.shape_cast %15 : vector<1x8x7xf32> to vector<8x7xf32>
    %cst_14 = arith.constant dense<0.000000e+00> : vector<8x128xf32>
    %17 = tpu.matmul %16, %12, %cst_14 {dimension_numbers = #tpu.dot_dimension_numbers<[1], [0], [0], [1], [0, 0, 1, 1], [], []>} : vector<8x7xf32>, vector<7x128xf32>, vector<8x128xf32> -> vector<8x128xf32>
    %18 = vector.broadcast %14 : vector<8x1xf32> to vector<8x128xf32>
    %19 = arith.addf %18, %17 : vector<8x128xf32>
    %c1 = arith.constant 1 : index
    %c0_15 = arith.constant 0 : index
    %c0_16 = arith.constant 0 : index
    %20 = vector.load %arg5[%c1, %c0_15, %c0_16] : memref<3x8x1xf32, #tpu.memory_space<vmem>>, vector<1x8x1xf32>
    %21 = vector.shape_cast %20 : vector<1x8x1xf32> to vector<8x1xf32>
    %c1_17 = arith.constant 1 : index
    %c0_18 = arith.constant 0 : index
    %c0_19 = arith.constant 0 : index
    %22 = vector.load %arg4[%c1_17, %c0_18, %c0_19] : memref<3x8x7xf32, #tpu.memory_space<vmem>>, vector<1x8x7xf32>
    %23 = vector.shape_cast %22 : vector<1x8x7xf32> to vector<8x7xf32>
    %cst_20 = arith.constant dense<0.000000e+00> : vector<8x128xf32>
    %24 = tpu.matmul %23, %12, %cst_20 {dimension_numbers = #tpu.dot_dimension_numbers<[1], [0], [0], [1], [0, 0, 1, 1], [], []>} : vector<8x7xf32>, vector<7x128xf32>, vector<8x128xf32> -> vector<8x128xf32>
    %25 = vector.broadcast %21 : vector<8x1xf32> to vector<8x128xf32>
    %26 = arith.addf %25, %24 : vector<8x128xf32>
    %27 = arith.mulf %19, %26 : vector<8x128xf32>
    %c2 = arith.constant 2 : index
    %c0_21 = arith.constant 0 : index
    %c0_22 = arith.constant 0 : index
    %28 = vector.load %arg5[%c2, %c0_21, %c0_22] : memref<3x8x1xf32, #tpu.memory_space<vmem>>, vector<1x8x1xf32>
    %29 = vector.shape_cast %28 : vector<1x8x1xf32> to vector<8x1xf32>
    %c2_23 = arith.constant 2 : index
    %c0_24 = arith.constant 0 : index
    %c0_25 = arith.constant 0 : index
    %30 = vector.load %arg4[%c2_23, %c0_24, %c0_25] : memref<3x8x7xf32, #tpu.memory_space<vmem>>, vector<1x8x7xf32>
    %31 = vector.shape_cast %30 : vector<1x8x7xf32> to vector<8x7xf32>
    %cst_26 = arith.constant dense<0.000000e+00> : vector<8x128xf32>
    %32 = tpu.matmul %31, %12, %cst_26 {dimension_numbers = #tpu.dot_dimension_numbers<[1], [0], [0], [1], [0, 0, 1, 1], [], []>} : vector<8x7xf32>, vector<7x128xf32>, vector<8x128xf32> -> vector<8x128xf32>
    %33 = vector.broadcast %29 : vector<8x1xf32> to vector<8x128xf32>
    %34 = arith.addf %33, %32 : vector<8x128xf32>
    %35 = arith.mulf %27, %34 : vector<8x128xf32>
    %c0_27 = arith.constant 0 : index
    %c0_28 = arith.constant 0 : index
    %36 = vector.load %arg6[%c0_27, %c0_28] : memref<4x8xf32, #tpu.memory_space<vmem>>, vector<4x8xf32>
    %cst_29 = arith.constant dense<0.000000e+00> : vector<4x128xf32>
    %37 = tpu.matmul %36, %35, %cst_29 {dimension_numbers = #tpu.dot_dimension_numbers<[1], [0], [0], [1], [0, 0, 1, 1], [], []>} : vector<4x8xf32>, vector<8x128xf32>, vector<4x128xf32> -> vector<4x128xf32>
    %c0_30 = arith.constant 0 : index
    %c0_31 = arith.constant 0 : index
    %38 = vector.load %arg7[%c0_30, %c0_31] : memref<4x128xf32, #tpu.memory_space<vmem>>, vector<4x128xf32>
    tpu.vector_store %arg7[%c0_30, %c0_31], %37 {strides = array<i32>} : memref<4x128xf32, #tpu.memory_space<vmem>>, vector<4x128xf32>,
    return
  }
  func.func @transform_0(%arg0: i32) -> (i32, i32) {
    %c0_i32 = arith.constant 0 : i32
    %c0_i32_0 = arith.constant 0 : i32
    return %c0_i32, %arg0 : i32, i32
  }
  func.func @transform_1(%arg0: i32) -> (i32, i32) {
    %c0_i32 = arith.constant 0 : i32
    %c0_i32_0 = arith.constant 0 : i32
    %c0_i32_1 = arith.constant 0 : i32
    return %c0_i32, %c0_i32_0 : i32, i32
  }
  func.func @transform_2(%arg0: i32) -> (i32, i32) {
    %c0_i32 = arith.constant 0 : i32
    %c0_i32_0 = arith.constant 0 : i32
    %c0_i32_1 = arith.constant 0 : i32
    return %c0_i32, %c0_i32_0 : i32, i32
  }
  func.func @transform_3(%arg0: i32) -> (i32, i32, i32) {
    %c0_i32 = arith.constant 0 : i32
    %c0_i32_0 = arith.constant 0 : i32
    %c0_i32_1 = arith.constant 0 : i32
    %c0_i32_2 = arith.constant 0 : i32
    return %c0_i32, %c0_i32_0, %c0_i32_1 : i32, i32, i32
  }
  func.func @transform_4(%arg0: i32) -> (i32, i32, i32) {
    %c0_i32 = arith.constant 0 : i32
    %c0_i32_0 = arith.constant 0 : i32
    %c0_i32_1 = arith.constant 0 : i32
    %c0_i32_2 = arith.constant 0 : i32
    return %c0_i32, %c0_i32_0, %c0_i32_1 : i32, i32, i32
  }
  func.func @transform_5(%arg0: i32) -> (i32, i32) {
    %c0_i32 = arith.constant 0 : i32
    %c0_i32_0 = arith.constant 0 : i32
    %c0_i32_1 = arith.constant 0 : i32
    return %c0_i32, %c0_i32_0 : i32, i32
  }
  func.func @transform_6(%arg0: i32) -> (i32, i32) {
    %c0_i32 = arith.constant 0 : i32
    %c0_i32_0 = arith.constant 0 : i32
    return %c0_i32, %arg0 : i32, i32
  }
}

</mosaic_0001>

<bundles_post_ra>
// kernel: tpu_custom_call.1
= control target key start
LH: loop header
LB: loop body
LE: loop exit
PB: predicated region body
PF: predicated region fallthrough
CT: control target
= control target key end

     0   :  { %11 = vsyncpa [#allocation3], 0  ;;  %s371_s0 = inlined_call_operand.hbm [shape: f32[16,128], index: 0, kind: input, shape index: {}]   ;;  %s372_s1 = inlined_call_operand.vmem [shape: f32[7,16], index: 1, kind: input, shape index: {}]   ;;  %s373_s2 = inlined_call_operand.vmem [shape: f32[7,1], index: 2, kind: input, shape index: {}]   ;;  %s374_s3 = inlined_call_operand.vmem [shape: f32[3,8,7], index: 3, kind: input, shape index: {}]   ;;  %s375_s4 = inlined_call_operand.vmem [shape: f32[3,8,1], index: 4, kind: input, shape index: {}]   ;;  %s376_s5 = inlined_call_operand.vmem [shape: f32[4,8], index: 5, kind: input, shape index: {}]   ;;  %s377_s6 = inlined_call_operand.hbm [shape: f32[4,128], index: 6, kind: output, shape index: {}]  }
   0x1   :  { %12 = vsyncpa [#allocation4], 0  ;;  %s17_s23 = sshll.u32 %s371_s0, 4  ;;  %s298_s24 = smov [#allocation2]   ;;  %s18_s23 = int_to_ptr.hbm [resolvable:$true] %s17_s23 }
   0x2   :  { %s19_s25 = sshll.u32 %s298_s24, 4  ;;  %s299_s26 = smov 128   ;;  %s20_s25 = int_to_ptr.vmem [resolvable:$true] %s19_s25 }
   0x3   :  { %s300_s27 = smov 8  }
   0x4   :  { %25 = dma.hbm_to_vmem [thread:$0]  %s18_s23, 256, %s20_s25, [#allocation3], %s299_s26, %s299_s26, %s300_s27  }
   0x5   :  { %294 = dma.done.wait [#allocation3], 256  }
   0x6   :  { %295 = vsyncadd [#allocation3], 4294967040  ;;  %v301_v0 = vmov 0   ;;  %v42_v1 = vld [vmem:[#allocation2 + $0x8] sm:$0xff]  ;;  %v41_v2 = vld [vmem:[#allocation2] sm:$0xff]  ;;  %vm43_vm0 = vcmask 130048  }
   0x7   :  { %242 = vset.pattern.permute.xlu0 %v301_v0  ;;  %243 = vset.pattern.permute.xlu1 %v301_v0  ;;  %v40_v3 = vld [vmem:[%s372_s1] sm:$0x7f]  ;;  %v228_v6 = vld [vmem:[%s375_s4 + $0x8] sm:$0xff]  ;;  %v232_v7 = vld [vmem:[%s375_s4 + $0x10] sm:$0xff]  ;;  %vm84_vm1 = vcmask 1046528   ;;  %vm80_vm2 = vcmask 56320  }
   0x8   :  { %61 = vmatpush.msra.mxu0 %v42_v1  ;;  %v67_v4 = vld [vmem:[%s373_s2] sm:$0x7f]  ;;  %143 = vperm.xlu1 %243, %v228_v6   ;;  %v229_v16 = vld [vmem:[%s374_s3 + $0x8] sm:$0xff]  ;;  %v233_v17 = vld [vmem:[%s374_s3 + $0x10] sm:$0xff]  ;;  %vm183_vm3 = vcmask 64512   ;;  %s215_s21 = sshll.u32 %s377_s6, 4  ;;  %s216_s21 = int_to_ptr.hbm [resolvable:$true] %s215_s21 }
   0x9   :  { %70 = vperm.xlu0 %242, %v67_v4   ;;  %v78_v5 = vld [vmem:[%s375_s4] sm:$0xff] }
   0xa   :  { %62 = vmatpush.msra.mxu0 %v41_v2  ;;  %v79_v15 = vld [vmem:[%s374_s3] sm:$0xff]  ;;  %s302_s3 = smov [#allocation5]  }
   0xb   :  { %225 = vmatmul.msk.f32.vlgmr.msra.gmra.mxu0 %vm43_vm0, %v40_v3  ;;  %v182_v29 = vld [vmem:[%s376_s5] sm:$0xf]  ;;  %s213_s18 = sshll.u32 %s302_s3, 4  ;;  %s214_s18 = int_to_ptr.vmem [resolvable:$true] %s213_s18 }
  0x10   :  { %177 = vperm.xlu1 %243, %v232_v7  }
  0x11   :  { %110 = vperm.xlu0 %242, %v78_v5  }
  0x7a   :  { %v144_v18 = vpop.permute.xlu1 %143 }
  0x7b   :  { %v71_v8 = vpop.permute.xlu0 %70 }
  0x82   :  { %v178_v25 = vpop.permute.xlu1 %177 }
  0x83   :  { %v111_v20 = vpop.permute.xlu0 %110 }
  0x88   :  { %v64_v9 = vpop.f32.mrf.mxu0 }
  0x89   :  { %v73_v10 = vsub.f32 %v71_v8, %v64_v9 }
  0x8b   :  { %v74_v11 = vmul.f32 0.5, %v73_v10 }
  0x8d   :  { %244 = vtanh.f32 %v74_v11 }
  0x93   :  { %v245_v12 = vpop.eup %244 }
  0x94   :  { %v76_v13 = vmul.f32 0.5, %v245_v12 }
  0x96   :  { %v77_v14 = vadd.f32 0.5, %v76_v13 }
  0x98   :  { %226 = vmatpush.msk.msra.mxu1 %vm84_vm1, %v77_v14  ;;  %230 = vmatpush.msk.msra.mxu2 %vm84_vm1, %v77_v14 }
  0x99   :  { %234 = vmatpush.msk.msra.mxu3 %vm84_vm1, %v77_v14  ;;  %227 = vmatmul.msk.f32.vlgmr.msra.gmra.mxu1 %vm80_vm2, %v79_v15 }
  0x9a   :  { %231 = vmatmul.msk.f32.vlgmr.msra.gmra.mxu2 %vm80_vm2, %v229_v16  ;;  %235 = vmatmul.msk.f32.vlgmr.msra.gmra.mxu3 %vm80_vm2, %v233_v17 }
 0x116   :  { %v105_v19 = vpop.f32.mrf.mxu1 }
 0x117   :  { %v113_v23 = vadd.f32 %v111_v20, %v105_v19 }
 0x11d   :  { %v138_v21 = vpop.f32.mrf.mxu2  ;;  %v172_v22 = vpop.f32.mrf.mxu3 }
 0x11e   :  { %v146_v24 = vadd.f32 %v144_v18, %v138_v21  ;;  %v180_v27 = vadd.f32 %v178_v25, %v172_v22 }
 0x120   :  { %v147_v26 = vmul.f32 %v146_v24, %v113_v23 }
 0x122   :  { %v181_v28 = vmul.f32 %v180_v27, %v147_v26 }
 0x124   :  { %202 = vmatpush.msrb.mxu1 %v181_v28 }
 0x125   :  { %236 = vmatmul.msk.f32.vlgmr.msrb.gmra.mxu1 %vm183_vm3, %v182_v29 }
 0x1a2   :  { %v204_v30 = vpop.f32.mrf.mxu1 }
 0x1a3   :  { %207 = vst [vmem:[#allocation5] sm:$0xf] %v204_v30 }
 0x1a4   :  { %218 = dma.vmem_to_hbm [thread:$0]  %s214_s18, 64, %s216_s21, [#allocation4]  }
 0x1a5   :  { %296 = dma.done.wait [#allocation4], 64  }
 0x1a6   :  { %297 = vsyncadd [#allocation4], 4294967232 }
 0x1a7   :  { %223 = vsyncpa [#allocation3], 1 }
 0x1a8   :  { %224 = vsyncpa [#allocation4], 1 }

</bundles_post_ra>
